<compile_context>
chip_gen: v6e
topology: v6e:2x2x1
jax: 0.10.0
libtpu: 0.0.40
codegen_flags: <defaults>
</compile_context>

<pallas_src>
import functools

import jax
import jax.numpy as jnp
from jax import lax
from jax.experimental import pallas as pl
from jax.experimental.pallas import tpu as pltpu


def _loss_tile_kernel(e1_ref, e2_ref, out_ref, acc_ref, *, tile, n_diag):
    i = pl.program_id(0)
    j = pl.program_id(1)
    k = pl.program_id(2)

    @pl.when(k == 0)
    def _():
        acc_ref[...] = jnp.zeros_like(acc_ref)

    # NT matmul on the MXU: contract the feature dim of both operands.
    acc_ref[...] += lax.dot_general(
        e1_ref[...], e2_ref[...],
        dimension_numbers=(((1,), (1,)), ((), ())),
        preferred_element_type=jnp.float32,
    )  # (tile, tile)

    @pl.when(k == pl.num_programs(2) - 1)
    def _():
        sim = acc_ref[...]
        relu = jnp.maximum(sim, 0.0)
        # Every tile: off-diagonal contribution = sum(relu(sim)).
        out_ref[0, 0] = jnp.sum(relu)

        # Only diagonal tiles: replace relu(sim) with (1 - sim) on the (valid)
        # global diagonal.
        @pl.when(i == j)
        def _():
            row = lax.broadcasted_iota(jnp.int32, (tile, tile), 0)
            col = lax.broadcasted_iota(jnp.int32, (tile, tile), 1)
            g_row = i * tile + row
            on_diag = (row == col) & (g_row < n_diag)
            corr = jnp.where(on_diag, (1.0 - sim) - relu, 0.0)
            out_ref[0, 0] = out_ref[0, 0] + jnp.sum(corr)


def _round_up(x, m):
    return ((x + m - 1) // m) * m


def my_loss_v2(emb_1, emb_2, *, tile=256, dk=2048):
    """Pallas TPU MyLossV2 forward. Returns a scalar f32."""
    N, D = emb_1.shape
    M, D2 = emb_2.shape
    assert D == D2, "feature dims must match"

    # F.normalize(x, dim=1): x / max(||x||_2, eps), eps = 1e-12. Hoisted out
    # of the (i, j) grid — done once per row here instead of grid_n/grid_m
    # times inside the kernel.
    eps = jnp.float32(1e-12)
    e1 = emb_1.astype(jnp.float32)
    e2 = emb_2.astype(jnp.float32)
    e1n = e1 / jnp.maximum(jnp.sqrt(jnp.sum(e1 * e1, axis=1, keepdims=True)), eps)
    e2n = e2 / jnp.maximum(jnp.sqrt(jnp.sum(e2 * e2, axis=1, keepdims=True)), eps)

    # Square tiles (sublane-aligned) so the global diagonal only appears in
    # (i == j) tiles. Pad N/M to tile multiples with zero rows: normalized
    # zero rows give sim == 0 -> relu contributes 0, and the diagonal
    # correction is masked to the valid diagonal, so padding adds nothing.
    t = min(tile, _round_up(max(N, M), 8))
    t = _round_up(t, 8)
    Np = _round_up(N, t)
    Mp = _round_up(M, t)

    # Feature-dim chunking: if D fits in one block, use the full dim (no lane
    # constraint when block == array dim); otherwise split into lane-aligned
    # dk-wide chunks and pad D with zero columns (zeros add nothing to dots;
    # padding happens AFTER normalization so norms are unaffected).
    if D <= dk:
        tk = D
        Dp = D
    else:
        tk = _round_up(dk, 128)
        Dp = _round_up(D, tk)

    if Np != N or Dp != D:
        e1n = jnp.pad(e1n, ((0, Np - N), (0, Dp - D)))
    if Mp != M or Dp != D:
        e2n = jnp.pad(e2n, ((0, Mp - M), (0, Dp - D)))

    gm = Np // t
    gn = Mp // t
    gk = Dp // tk
    n_diag = min(N, M)

    kernel = functools.partial(_loss_tile_kernel, tile=t, n_diag=n_diag)

    partials = pl.pallas_call(
        kernel,
        out_shape=jax.ShapeDtypeStruct((gm, gn), jnp.float32),
        grid=(gm, gn, gk),
        in_specs=[
            pl.BlockSpec((t, tk), lambda i, j, k: (i, k)),   # emb_1 tile
            pl.BlockSpec((t, tk), lambda i, j, k: (j, k)),   # emb_2 tile
        ],
        out_specs=pl.BlockSpec((1, 1), lambda i, j, k: (i, j),
                               memory_space=pltpu.SMEM),
        scratch_shapes=[pltpu.VMEM((t, t), jnp.float32)],
        compiler_params=pltpu.CompilerParams(
            dimension_semantics=("parallel", "parallel", "arbitrary"),
            vmem_limit_bytes=64 << 20,
        ),
        cost_estimate=pl.CostEstimate(
            flops=2 * Np * Mp * Dp,
            transcendentals=0,
            bytes_accessed=(Np * Dp * gn + Mp * Dp * gm + gm * gn) * 4,
        ),
    )(e1n, e2n)

    # Finalize: mean over the ORIGINAL (N, M) elements.
    return jnp.sum(partials) / jnp.float32(N * M)


def _reference(emb_1, emb_2):
    # Pure-JAX reference of the PyTorch forward, for a sanity check.
    e1 = emb_1 / jnp.maximum(jnp.linalg.norm(emb_1, axis=1, keepdims=True), 1e-12)
    e2 = emb_2 / jnp.maximum(jnp.linalg.norm(emb_2, axis=1, keepdims=True), 1e-12)
    sim = e1 @ e2.T
    n, m = sim.shape
    label = -jnp.ones_like(sim) + jnp.eye(n, m) * 2
    pos = (1.0 - sim) * (label == 1)
    neg = jnp.maximum(sim, 0.0) * (label == -1)
    return jnp.mean(pos + neg)


if __name__ == "__main__":
    key = jax.random.PRNGKey(0)
    k1, k2 = jax.random.split(key)
    N, M, D = 8, 8, 32  # small shapes: batch of 8 embeddings, hidden=32
    emb_1 = jax.random.normal(k1, (N, D), dtype=jnp.float32)
    emb_2 = jax.random.normal(k2, (M, D), dtype=jnp.float32)

    loss = my_loss_v2(emb_1, emb_2)
    jax.block_until_ready(loss)

    ref = _reference(emb_1, emb_2)
    assert jnp.allclose(loss, ref, atol=1e-5, rtol=1e-5), (loss, ref)

    # A second, non-square / multi-tile case exercising the 2-D grid, the
    # row/col zero-padding, the diagonal guard AND the feature-dim (k)
    # chunking path (tile / dk forced small).
    N2, M2, D2 = 24, 40, 200
    a = jax.random.normal(jax.random.PRNGKey(1), (N2, D2), dtype=jnp.float32)
    b = jax.random.normal(jax.random.PRNGKey(2), (M2, D2), dtype=jnp.float32)
    loss2 = my_loss_v2(a, b, tile=16, dk=128)
    jax.block_until_ready(loss2)
    ref2 = _reference(a, b)
    assert jnp.allclose(loss2, ref2, atol=1e-5, rtol=1e-5), (loss2, ref2)

    print("KERNEL_OK")
</pallas_src>

<mosaic_0001>
module attributes {stable_mosaic.version = 11 : i64} {
  func.func @_loss_tile_kernel(%arg0: i32, %arg1: i32, %arg2: i32, %arg3: memref<8x32xf32, #tpu.memory_space<vmem>>, %arg4: memref<8x32xf32, #tpu.memory_space<vmem>>, %arg5: memref<1x1xf32, #tpu.memory_space<smem>>, %arg6: memref<8x8xf32, #tpu.memory_space<vmem>>) attributes {dimension_semantics = [#tpu.dimension_semantics<parallel>, #tpu.dimension_semantics<parallel>, #tpu.dimension_semantics<arbitrary>], iteration_bounds = array<i64: 1, 1, 1>, scalar_prefetch = 0 : i64, scratch_operands = 1 : i64, tpu.core_type = #tpu.core_type<tc>, window_params = [{transform_indices = @transform_0, window_bounds = array<i64: 8, 32>}, {transform_indices = @transform_1, window_bounds = array<i64: 8, 32>}, {transform_indices = @transform_2, window_bounds = array<i64: 1, 1>}]} {
    %c0_i32 = arith.constant 0 : i32
    %0 = arith.cmpi eq, %arg2, %c0_i32 : i32
    %1 = arith.extui %0 : i1 to i32
    %c0_i32_0 = arith.constant 0 : i32
    %2 = arith.cmpi ne, %1, %c0_i32_0 : i32
    scf.if %2 {
      %cst_10 = arith.constant 0.000000e+00 : f32
      %12 = vector.broadcast %cst_10 : f32 to vector<8x8xf32>
      %c0_11 = arith.constant 0 : index
      %c0_12 = arith.constant 0 : index
      %13 = vector.load %arg6[%c0_11, %c0_12] : memref<8x8xf32, #tpu.memory_space<vmem>>, vector<8x8xf32>
      tpu.vector_store %arg6[%c0_11, %c0_12], %12 {strides = array<i32>} : memref<8x8xf32, #tpu.memory_space<vmem>>, vector<8x8xf32>,
    } else {
    }
    %c0 = arith.constant 0 : index
    %c0_1 = arith.constant 0 : index
    %3 = vector.load %arg6[%c0, %c0_1] : memref<8x8xf32, #tpu.memory_space<vmem>>, vector<8x8xf32>
    %c0_2 = arith.constant 0 : index
    %c0_3 = arith.constant 0 : index
    %4 = vector.load %arg3[%c0_2, %c0_3] : memref<8x32xf32, #tpu.memory_space<vmem>>, vector<8x32xf32>
    %c0_4 = arith.constant 0 : index
    %c0_5 = arith.constant 0 : index
    %5 = vector.load %arg4[%c0_4, %c0_5] : memref<8x32xf32, #tpu.memory_space<vmem>>, vector<8x32xf32>
    %cst = arith.constant dense<0.000000e+00> : vector<8x8xf32>
    %6 = tpu.matmul %4, %5, %cst {dimension_numbers = #tpu.dot_dimension_numbers<[1], [1], [0], [0], [0, 0, 1, 0], [], []>} : vector<8x32xf32>, vector<8x32xf32>, vector<8x8xf32> -> vector<8x8xf32>
    %7 = arith.addf %3, %6 : vector<8x8xf32>
    %c0_6 = arith.constant 0 : index
    %c0_7 = arith.constant 0 : index
    %8 = vector.load %arg6[%c0_6, %c0_7] : memref<8x8xf32, #tpu.memory_space<vmem>>, vector<8x8xf32>
    tpu.vector_store %arg6[%c0_6, %c0_7], %7 {strides = array<i32>} : memref<8x8xf32, #tpu.memory_space<vmem>>, vector<8x8xf32>,
    %c0_i32_8 = arith.constant 0 : i32
    %9 = arith.cmpi eq, %arg2, %c0_i32_8 : i32
    %10 = arith.extui %9 : i1 to i32
    %c0_i32_9 = arith.constant 0 : i32
    %11 = arith.cmpi ne, %10, %c0_i32_9 : i32
    scf.if %11 {
      %c0_10 = arith.constant 0 : index
      %c0_11 = arith.constant 0 : index
      %12 = vector.load %arg6[%c0_10, %c0_11] : memref<8x8xf32, #tpu.memory_space<vmem>>, vector<8x8xf32>
      %cst_12 = arith.constant 0.000000e+00 : f32
      %13 = vector.broadcast %cst_12 : f32 to vector<8x8xf32>
      %14 = arith.maximumf %12, %13 : vector<8x8xf32>
      %15 = vector.shape_cast %14 : vector<8x8xf32> to vector<1x8x8xf32>
      %cst_13 = arith.constant dense<0.000000e+00> : vector<1xf32>
      %16 = vector.multi_reduction <add>, %15, %cst_13 [1, 2] : vector<1x8x8xf32> to vector<1xf32>
      %17 = vector.shape_cast %16 : vector<1xf32> to vector<1x1x1xf32>
      %18 = vector.extract %17[0, 0, 0] : f32 from vector<1x1x1xf32>
      %c0_14 = arith.constant 0 : index
      %c0_15 = arith.constant 0 : index
      %19 = memref.load %arg5[%c0_14, %c0_15] : memref<1x1xf32, #tpu.memory_space<smem>>
      memref.store %18, %arg5[%c0_14, %c0_15] : memref<1x1xf32, #tpu.memory_space<smem>>
      %20 = arith.cmpi eq, %arg0, %arg1 : i32
      %21 = arith.extui %20 : i1 to i32
      %c0_i32_16 = arith.constant 0 : i32
      %22 = arith.cmpi ne, %21, %c0_i32_16 : i32
      scf.if %22 {
        %23 = tpu.iota {dimensions = array<i32: 0>} : vector<8x8xi32>
        %24 = tpu.iota {dimensions = array<i32: 1>} : vector<8x8xi32>
        %c8_i32 = arith.constant 8 : i32
        %25 = arith.muli %arg0, %c8_i32 : i32
        %26 = vector.broadcast %25 : i32 to vector<8x8xi32>
        %27 = arith.addi %26, %23 : vector<8x8xi32>
        %28 = arith.cmpi eq, %23, %24 : vector<8x8xi32>
        %c8_i32_17 = arith.constant 8 : i32
        %29 = vector.broadcast %c8_i32_17 : i32 to vector<8x8xi32>
        %30 = arith.cmpi slt, %27, %29 : vector<8x8xi32>
        %31 = arith.andi %28, %30 : vector<8x8xi1>
        %cst_18 = arith.constant 1.000000e+00 : f32
        %32 = vector.broadcast %cst_18 : f32 to vector<8x8xf32>
        %33 = arith.subf %32, %12 : vector<8x8xf32>
        %34 = arith.subf %33, %14 : vector<8x8xf32>
        %cst_19 = arith.constant 0.000000e+00 : f32
        %35 = vector.broadcast %cst_19 : f32 to vector<8x8xf32>
        %36 = arith.select %31, %34, %35 : vector<8x8xi1>, vector<8x8xf32>
        %c0_20 = arith.constant 0 : index
        %c0_21 = arith.constant 0 : index
        %37 = memref.load %arg5[%c0_20, %c0_21] : memref<1x1xf32, #tpu.memory_space<smem>>
        %38 = vector.shape_cast %36 : vector<8x8xf32> to vector<1x8x8xf32>
        %cst_22 = arith.constant dense<0.000000e+00> : vector<1xf32>
        %39 = vector.multi_reduction <add>, %38, %cst_22 [1, 2] : vector<1x8x8xf32> to vector<1xf32>
        %40 = vector.shape_cast %39 : vector<1xf32> to vector<1x1x1xf32>
        %41 = vector.extract %40[0, 0, 0] : f32 from vector<1x1x1xf32>
        %42 = arith.addf %37, %41 : f32
        %c0_23 = arith.constant 0 : index
        %c0_24 = arith.constant 0 : index
        %43 = memref.load %arg5[%c0_23, %c0_24] : memref<1x1xf32, #tpu.memory_space<smem>>
        memref.store %42, %arg5[%c0_23, %c0_24] : memref<1x1xf32, #tpu.memory_space<smem>>
      } else {
      }
    } else {
    }
    return
  }
  func.func @transform_0(%arg0: i32, %arg1: i32, %arg2: i32) -> (i32, i32) {
    %c0_i32 = arith.constant 0 : i32
    return %arg0, %arg2 : i32, i32
  }
  func.func @transform_1(%arg0: i32, %arg1: i32, %arg2: i32) -> (i32, i32) {
    %c0_i32 = arith.constant 0 : i32
    return %arg1, %arg2 : i32, i32
  }
  func.func @transform_2(%arg0: i32, %arg1: i32, %arg2: i32) -> (i32, i32) {
    %c0_i32 = arith.constant 0 : i32
    return %arg0, %arg1 : i32, i32
  }
}

</mosaic_0001>

<bundles_post_ra>
// kernel: tpu_custom_call.1
= control target key start
LH: loop header
LB: loop body
LE: loop exit
PB: predicated region body
PF: predicated region fallthrough
CT: control target
= control target key end

     0   :  { %7 = vsyncpa [#allocation4], 0  ;;  %s292_s0 = inlined_call_operand.hbm [shape: f32[8,32], index: 0, kind: input, shape index: {}]   ;;  %s293_s1 = inlined_call_operand.hbm [shape: f32[8,32], index: 1, kind: input, shape index: {}]   ;;  %s294_s2 = inlined_call_operand.hbm [shape: f32[1,1], index: 2, kind: output, shape index: {}]  }
   0x1   :  { %8 = vsyncpa [#allocation7], 0 }
   0x2   :  { %9 = vsyncpa [#allocation5], 0  ;;  %s259_s9 = smov [#allocation3]   ;;  %s260_s11 = smov [#allocation6]  }
   0x3   :  { %s16_s10 = sshll.u32 %s259_s9, 4  ;;  %s26_s12 = sshll.u32 %s260_s11, 4  ;;  %s17_s10 = int_to_ptr.vmem [resolvable:$true] %s16_s10  ;;  %s27_s12 = int_to_ptr.vmem [resolvable:$true] %s26_s12 }
   0x4   :  { %s213_s13 = scalar_lea.vmem %s17_s10, 128  ;;  %p218_p1 = scmp.lt.s32.totalorder %s17_s10, %s17_s10 }
   0x5   :  { %p214_p0 = scmp.ne.s32.totalorder %s17_s10, %s213_s13  ;;  %p219_p2 = scmp.lt.s32.totalorder %s213_s13, %s213_s13 }
   0x7   :  { %p220_p3 = por %p219_p2, %p218_p1 }
   0x9   :  { %p221_p4 = pnand %p220_p3, %p214_p0 }
   0xb   :  { %224 = shalt.err (!%p221_p4)
}
   0xc   :  { %19 = dma.hbm_to_vmem [thread:$0]  %s292_s0, 128, %s17_s10, [#allocation4]  }
   0xd   :  { %s233_s16 = scalar_lea.vmem %s27_s12, 128  ;;  %p238_p6 = scmp.lt.s32.totalorder %s27_s12, %s27_s12 }
   0xe   :  { %p234_p5 = scmp.ne.s32.totalorder %s27_s12, %s233_s16  ;;  %p239_p7 = scmp.lt.s32.totalorder %s233_s16, %s233_s16 }
  0x10   :  { %p240_p8 = por %p239_p7, %p238_p6 }
  0x12   :  { %p241_p9 = pnand %p240_p8, %p234_p5 }
  0x14   :  { %244 = shalt.err (!%p241_p9)
}
  0x15   :  { %29 = dma.hbm_to_vmem [thread:$0]  %s293_s1, 128, %s27_s12, [#allocation7]  }
  0x16   :  { %253 = dma.done.wait [#allocation4], 128  }
  0x17   :  { %254 = vsyncadd [#allocation4], 4294967168 }
  0x18   :  { %255 = dma.done.wait [#allocation7], 128  }
  0x19   :  { %256 = vsyncadd [#allocation7], 4294967168  ;;  %vm40_vm0 = vcmask 64512   ;;  %v261_v0 = vmov 0.0   ;;  %vm262_vm1 = vmmov 0   ;;  %vm45_vm2 = vcmask 261120  }
  0x1a   :  { %191 = vmatprep.subr.mxu0 %v261_v0  ;;  %193 = vmatprep.mubr.msk.f32.mxu0 %vm262_vm1, %v261_v0  ;;  %41 = vst.msk [vmem:[#allocation2] sm:$0xff] %vm40_vm0, %v261_v0  ;;  %v44_v1 = vld [vmem:[#allocation6] sm:$0xff]  ;;  %v43_v2 = vld [vmem:[#allocation3] sm:$0xff]  ;;  %v146_v7 = vlaneseq  ;;  %s263_s20 = smov [#allocation8]  }
  0x1b   :  { %192 = vmatpush3.xpose.msk.msra.mxu0 %vm45_vm2, %v44_v1 }
  0x1c   :  { %v147_v8 = vshrl.u32 %v146_v7, 7  ;;  %v149_v9 = vand.u32 127, %v146_v7 }
  0x1e   :  { %194 = vmatmul.mubr.msk.f32.vlgmr.msra.gmra.mxu0 %vm45_vm2, %v43_v2  ;;  %vm153_vm3 = vcmp.eq.s32.totalorder %v147_v8, %v149_v9 }
  0x21   :  { %v42_v3 = vld [vmem:[#allocation2] sm:$0xff] }
  0xde   :  { %v118_v4 = vpop.f32.mrf.mxu0 }
  0xdf   :  { %v122_v5 = vadd.f32 %v118_v4, %v42_v3 }
  0xe0   :  { %v195_v6 = vpop.f32.mrf.mxu0 }
  0xe1   :  { %124 = vst.msk [vmem:[#allocation2] sm:$0xff] %vm40_vm0, %v122_v5 }
  0xe8   :  { %v128_v10 = vld [vmem:[#allocation2] sm:$0xff] }
  0xe9   :  { %v129_v11 = vmax.f32 %v128_v10, 0.0  ;;  %v156_v12 = vsub.f32 1.0, %v128_v10 }
  0xeb   :  { %v130_v13 = vsel %vm40_vm0, %v129_v11, 0.0  ;;  %v157_v14 = vsub.f32 %v156_v12, %v129_v11 }
  0xec   :  { %131 = vadd.xlane.f32.xlu0 %v130_v13 }
  0xed   :  { %v158_v15 = vsel %vm153_vm3, %v157_v14, 0.0 }
  0xee   :  { %v160_v16 = vsel %vm40_vm0, %v158_v15, 0.0 }
  0xf0   :  { %161 = vadd.xlane.f32.xlu0 %v160_v16 }
 0x175   :  { %v132_v17 = vpop.xlane.xlu0 %131 }
 0x176   :  { %v133_v18 = vrot.slane %v132_v17, 4 }
 0x178   :  { %v134_v19 = vadd.f32 %v133_v18, %v132_v17 }
 0x179   :  { %v162_v20 = vpop.xlane.xlu0 %161 }
 0x17a   :  { %v135_v21 = vrot.slane %v134_v19, 2  ;;  %v163_v22 = vrot.slane %v162_v20, 4 }
 0x17c   :  { %v164_v23 = vadd.f32 %v163_v22, %v162_v20  ;;  %v136_v24 = vadd.f32 %v135_v21, %v134_v19 }
 0x17e   :  { %v165_v25 = vrot.slane %v164_v23, 2  ;;  %v137_v26 = vrot.slane %v136_v24, 1 }
 0x180   :  { %v166_v27 = vadd.f32 %v165_v25, %v164_v23  ;;  %v138_v28 = vadd.f32 %v137_v26, %v136_v24 }
 0x182   :  { %196 = vpush %v138_v28  ;;  %v167_v29 = vrot.slane %v166_v27, 1 }
 0x184   :  { %v168_v30 = vadd.f32 %v167_v29, %v166_v27 }
 0x186   :  { %198 = vpush %v168_v30 }
 0x1b3   :  { %s197_s0 = spop %196 }
 0x1b7   :  { %s199_s1 = spop %198 }
 0x1b8   :  { %s170_s19 = sadd.f32 %s199_s1, %s197_s0 }
 0x1ba   :  { %171 = sst [smem:[#allocation8]] %s170_s19 }
 0x1bb   :  { %179 = dma.smem_to_hbm %s263_s20, 16, %s294_s2, [#allocation5]  }
 0x1bc   :  { %257 = dma.done.wait [#allocation5], 16  }
 0x1bd   :  { %258 = vsyncadd [#allocation5], 4294967280 }
 0x1be   :  { %183 = sfence }
 0x1bf   :  { %184 = vsyncpa [#allocation4], 1 }
 0x1c0   :  { %185 = vsyncpa [#allocation7], 1 }
 0x1c1   :  { %186 = vsyncpa [#allocation5], 1 }

</bundles_post_ra>
